<compile_context>
chip_gen: v5e
topology: v5e:2x2
jax: 0.10.0
libtpu: 0.0.40
codegen_flags: <defaults>
</compile_context>

<pallas_src>
import math
import functools

import jax
import jax.numpy as jnp
from jax import lax
from jax.experimental import pallas as pl
from jax.experimental.pallas import tpu as pltpu


def _e3nn_sh_basis(r, lmax):
    """Real spherical harmonics in e3nn convention, 'integral' normalization.

    r: (P, 3) unit vectors.  Returns (P, (lmax+1)**2).
    Matches e3nn.o3.spherical_harmonics(Irreps.spherical_harmonics(lmax),
                                        r, normalize=True) for lmax <= 2.
    """
    assert lmax <= 2, "raw SH polynomials implemented up to lmax=2"
    x, y, z = r[:, 0], r[:, 1], r[:, 2]
    cols = [jnp.ones_like(x)]                         # l = 0
    if lmax >= 1:
        cols += [x, y, z]                             # l = 1 (e3nn order)
    if lmax >= 2:
        s3 = math.sqrt(3.0)
        cols += [
            s3 * x * z,
            s3 * x * y,
            y * y - 0.5 * (x * x + z * z),
            s3 * y * z,
            (s3 / 2.0) * (z * z - x * x),
        ]
    # TODO(synk): extend raw polynomials above if lmax > 2 is ever needed.
    sh = jnp.stack(cols, axis=-1)
    norms = jnp.concatenate([
        jnp.full((2 * l + 1,), math.sqrt(2 * l + 1) / math.sqrt(4.0 * math.pi),
                 dtype=jnp.float32)
        for l in range(lmax + 1)
    ])
    return sh * norms[None, :]


def _weighted_point_loss_kernel(diff_ref, tgt_ref, sh_ref, out_ref, *,
                                topk, delta, inv_norm):
    sh = sh_ref[...]                                    # (D, P), MXU dtype
    # Two tiny MXU matmuls (fill/drain dominated, nowhere near the critical
    # path): one evaluates (input - target) at the points, one the target.
    dp = jnp.dot(diff_ref[...], sh, preferred_element_type=jnp.float32)  # (B,P)
    tp = jnp.dot(tgt_ref[...], sh, preferred_element_type=jnp.float32)   # (B,P)

    # Huber(input_pts, target_pts), reduction='none', weighted by 1/target.
    adiff = jnp.abs(dp)
    huber = jnp.where(adiff < delta, 0.5 * dp * dp,
                      delta * (adiff - 0.5 * delta))
    loss = huber * pl.reciprocal(tp, approx=True)       # (B, P) f32, EUP slot

    B, P = loss.shape
    n_drop = P - topk
    col = lax.broadcasted_iota(jnp.int32, (B, P), 1)

    # Order-preserving f32 -> int32 key with the lane index folded into the
    # cleared low mantissa bits: keys are unique per row, so ONE cross-lane
    # reduce per iteration selects exactly one element (ties / values within
    # 2**idx_bits - 1 ULPs are resolved by lane index; the final sum uses the
    # exact f32 values).
    idx_bits = max(1, (P - 1).bit_length())
    int_max = jnp.int32(jnp.iinfo(jnp.int32).max)
    int_min = jnp.int32(jnp.iinfo(jnp.int32).min)
    bits = pltpu.bitcast(loss, jnp.int32)
    skey = jnp.where(bits < 0, bits ^ int_max, bits)
    keyed = (skey & jnp.int32(-(1 << idx_bits))) | col

    row_sum = jnp.sum(loss, axis=1, keepdims=True)      # independent of chain

    if n_drop <= topk:
        # sum(top-k) = row_sum - sum(bottom n_drop): the shorter serial chain.
        mask = jnp.zeros((B, P), jnp.bool_)
        rem = keyed
        for _ in range(n_drop):                         # unrolled: LLO visibility
            m = jnp.min(rem, axis=1, keepdims=True)     # single XLU reduce / iter
            sel = rem == m                              # exactly one hit per row
            mask = jnp.logical_or(mask, sel)
            rem = jnp.where(sel, int_max, rem)
        drop_sum = jnp.sum(jnp.where(mask, loss, 0.0), axis=1, keepdims=True)
        topk_sum = row_sum - drop_sum
    else:
        # Direct top-k selection when it is the shorter chain.
        mask = jnp.zeros((B, P), jnp.bool_)
        rem = keyed
        for _ in range(topk):
            m = jnp.max(rem, axis=1, keepdims=True)
            sel = rem == m
            mask = jnp.logical_or(mask, sel)
            rem = jnp.where(sel, int_min, rem)
        topk_sum = jnp.sum(jnp.where(mask, loss, 0.0), axis=1, keepdims=True)

    # mean(topk_values / topk) == sum(topk_values) / (B * topk * topk)
    out_ref[0, 0] = jnp.sum(topk_sum) * inv_norm


def make_sh_basis(key, lmax=2, n_points=16, dtype=jnp.bfloat16):
    """Random unit points on the sphere -> transposed SH basis (D, P).

    Precompute and reuse when the same point set is evaluated repeatedly: the
    per-call randn + normalize + SH construction otherwise dominates wall-clock
    relative to the ~1 us kernel.
    """
    r = jax.random.normal(key, (n_points, 3), dtype=jnp.float32)
    r = r / jnp.linalg.norm(r, axis=1, keepdims=True)
    return _e3nn_sh_basis(r, lmax).T.astype(dtype)       # (D, P)


def weighted_point_loss_at_points(inp, tgt, sh_t, *, topk=10, delta=1.0,
                                  matmul_dtype=jnp.bfloat16):
    batch, dim = inp.shape
    n_points = sh_t.shape[1]
    assert tgt.shape == inp.shape and sh_t.shape[0] == dim
    assert topk <= n_points, "topk must be <= n_points (as in the torch module)"

    # f32 subtract (fused into the surrounding XLA graph under jit), then
    # narrow only the MXU operands; all post-matmul math stays f32 in-kernel.
    diff = (inp - tgt).astype(matmul_dtype)
    tgtc = tgt.astype(matmul_dtype)
    sh_c = sh_t.astype(matmul_dtype)

    kernel = functools.partial(
        _weighted_point_loss_kernel,
        topk=topk, delta=float(delta),
        inv_norm=1.0 / float(batch * topk * topk))

    itemsize = jnp.dtype(matmul_dtype).itemsize
    cost = pl.CostEstimate(
        flops=2 * 2 * batch * dim * n_points,
        transcendentals=batch * n_points,
        bytes_accessed=(2 * batch * dim + dim * n_points) * itemsize + 4)

    # TODO(synk): if this loss is evaluated for many (batch, point-set)
    # instances per step, fold them into ONE pallas_call with a "parallel" grid
    # axis and a pl.when-init/finalize scalar accumulator: amortizes the
    # ~0.35 us launch overhead, packs up to 8 point-sets onto the 128 lanes,
    # and engages both v7x TensorCores (tiles sized for v7x's 64 MiB VMEM).
    out = pl.pallas_call(
        kernel,
        out_shape=jax.ShapeDtypeStruct((1, 1), jnp.float32),
        in_specs=[
            pl.BlockSpec(memory_space=pltpu.MemorySpace.VMEM),
            pl.BlockSpec(memory_space=pltpu.MemorySpace.VMEM),
            pl.BlockSpec(memory_space=pltpu.MemorySpace.VMEM),
        ],
        out_specs=pl.BlockSpec(memory_space=pltpu.MemorySpace.SMEM),
        cost_estimate=cost,
    )(diff, tgtc, sh_c)
    return out[0, 0]


@functools.partial(
    jax.jit,
    static_argnames=("lmax", "n_points", "topk", "delta", "matmul_dtype"))
def weighted_point_loss(inp, tgt, key, *, lmax=2, n_points=16, topk=10,
                        delta=1.0, matmul_dtype=jnp.bfloat16):
    dim = (lmax + 1) ** 2
    assert inp.shape[-1] == dim and tgt.shape == inp.shape
    sh_t = make_sh_basis(key, lmax, n_points, dtype=matmul_dtype)
    return weighted_point_loss_at_points(inp, tgt, sh_t, topk=topk, delta=delta,
                                         matmul_dtype=matmul_dtype)


if __name__ == "__main__":
    lmax, B, n_points, topk = 2, 8, 16, 10
    dim = (lmax + 1) ** 2                                              # 9

    key = jax.random.PRNGKey(0)
    k_in, k_tg, k_pts = jax.random.split(key, 3)
    inp = jax.random.normal(k_in, (B, dim), dtype=jnp.float32)
    tgt = jax.random.normal(k_tg, (B, dim), dtype=jnp.float32)

    loss = weighted_point_loss(inp, tgt, k_pts,
                               lmax=lmax, n_points=n_points, topk=topk)
    jax.block_until_ready(loss)
    print("KERNEL_OK")
</pallas_src>

<mosaic_0001>
module attributes {stable_mosaic.version = 11 : i64} {
  func.func @_weighted_point_loss_kernel(%arg0: memref<8x9xbf16, #tpu.memory_space<vmem>>, %arg1: memref<8x9xbf16, #tpu.memory_space<vmem>>, %arg2: memref<9x16xbf16, #tpu.memory_space<vmem>>, %arg3: memref<1x1xf32, #tpu.memory_space<smem>>) attributes {dimension_semantics = [], scalar_prefetch = 0 : i64, scratch_operands = 0 : i64, tpu.core_type = #tpu.core_type<tc>} {
    %c0 = arith.constant 0 : index
    %c0_0 = arith.constant 0 : index
    %0 = vector.load %arg2[%c0, %c0_0] : memref<9x16xbf16, #tpu.memory_space<vmem>>, vector<9x16xbf16>
    %c0_1 = arith.constant 0 : index
    %c0_2 = arith.constant 0 : index
    %1 = vector.load %arg0[%c0_1, %c0_2] : memref<8x9xbf16, #tpu.memory_space<vmem>>, vector<8x9xbf16>
    %cst = arith.constant dense<0.000000e+00> : vector<8x16xf32>
    %2 = tpu.matmul %1, %0, %cst {dimension_numbers = #tpu.dot_dimension_numbers<[1], [0], [0], [1], [0, 0, 1, 1], [], []>} : vector<8x9xbf16>, vector<9x16xbf16>, vector<8x16xf32> -> vector<8x16xf32>
    %c0_3 = arith.constant 0 : index
    %c0_4 = arith.constant 0 : index
    %3 = vector.load %arg1[%c0_3, %c0_4] : memref<8x9xbf16, #tpu.memory_space<vmem>>, vector<8x9xbf16>
    %cst_5 = arith.constant dense<0.000000e+00> : vector<8x16xf32>
    %4 = tpu.matmul %3, %0, %cst_5 {dimension_numbers = #tpu.dot_dimension_numbers<[1], [0], [0], [1], [0, 0, 1, 1], [], []>} : vector<8x9xbf16>, vector<9x16xbf16>, vector<8x16xf32> -> vector<8x16xf32>
    %5 = math.absf %2 : vector<8x16xf32>
    %cst_6 = arith.constant 1.000000e+00 : f32
    %6 = vector.broadcast %cst_6 : f32 to vector<8x16xf32>
    %7 = arith.cmpf olt, %5, %6 : vector<8x16xf32>
    %cst_7 = arith.constant 5.000000e-01 : f32
    %8 = vector.broadcast %cst_7 : f32 to vector<8x16xf32>
    %9 = arith.mulf %8, %2 : vector<8x16xf32>
    %10 = arith.mulf %9, %2 : vector<8x16xf32>
    %cst_8 = arith.constant 5.000000e-01 : f32
    %11 = vector.broadcast %cst_8 : f32 to vector<8x16xf32>
    %12 = arith.subf %5, %11 : vector<8x16xf32>
    %cst_9 = arith.constant 1.000000e+00 : f32
    %13 = vector.broadcast %cst_9 : f32 to vector<8x16xf32>
    %14 = arith.mulf %13, %12 : vector<8x16xf32>
    %15 = arith.select %7, %10, %14 : vector<8x16xi1>, vector<8x16xf32>
    %16 = tpu.reciprocal %4 {approx = true} : vector<8x16xf32> -> vector<8x16xf32>
    %17 = arith.mulf %15, %16 : vector<8x16xf32>
    %18 = tpu.iota {dimensions = array<i32: 1>} : vector<8x16xi32>
    %19 = tpu.bitcast %17 : vector<8x16xf32> -> vector<8x16xi32>
    %c0_i32 = arith.constant 0 : i32
    %20 = vector.broadcast %c0_i32 : i32 to vector<8x16xi32>
    %21 = arith.cmpi slt, %19, %20 : vector<8x16xi32>
    %c2147483647_i32 = arith.constant 2147483647 : i32
    %22 = vector.broadcast %c2147483647_i32 : i32 to vector<8x16xi32>
    %23 = arith.xori %19, %22 : vector<8x16xi32>
    %24 = arith.select %21, %23, %19 : vector<8x16xi1>, vector<8x16xi32>
    %c-16_i32 = arith.constant -16 : i32
    %25 = vector.broadcast %c-16_i32 : i32 to vector<8x16xi32>
    %26 = arith.andi %24, %25 : vector<8x16xi32>
    %27 = arith.ori %26, %18 : vector<8x16xi32>
    %cst_10 = arith.constant dense<0.000000e+00> : vector<8xf32>
    %28 = vector.multi_reduction <add>, %17, %cst_10 [1] : vector<8x16xf32> to vector<8xf32>
    %29 = vector.shape_cast %28 : vector<8xf32> to vector<8x1xf32>
    %false = arith.constant false
    %30 = vector.broadcast %false : i1 to vector<8x16xi1>
    %cst_11 = arith.constant dense<2147483647> : vector<8xi32>
    %31 = vector.multi_reduction <minsi>, %27, %cst_11 [1] : vector<8x16xi32> to vector<8xi32>
    %32 = vector.shape_cast %31 : vector<8xi32> to vector<8x1xi32>
    %33 = vector.broadcast %32 : vector<8x1xi32> to vector<8x16xi32>
    %34 = arith.cmpi eq, %27, %33 : vector<8x16xi32>
    %35 = arith.ori %30, %34 : vector<8x16xi1>
    %c2147483647_i32_12 = arith.constant 2147483647 : i32
    %36 = vector.broadcast %c2147483647_i32_12 : i32 to vector<8x16xi32>
    %37 = arith.select %34, %36, %27 : vector<8x16xi1>, vector<8x16xi32>
    %cst_13 = arith.constant dense<2147483647> : vector<8xi32>
    %38 = vector.multi_reduction <minsi>, %37, %cst_13 [1] : vector<8x16xi32> to vector<8xi32>
    %39 = vector.shape_cast %38 : vector<8xi32> to vector<8x1xi32>
    %40 = vector.broadcast %39 : vector<8x1xi32> to vector<8x16xi32>
    %41 = arith.cmpi eq, %37, %40 : vector<8x16xi32>
    %42 = arith.ori %35, %41 : vector<8x16xi1>
    %c2147483647_i32_14 = arith.constant 2147483647 : i32
    %43 = vector.broadcast %c2147483647_i32_14 : i32 to vector<8x16xi32>
    %44 = arith.select %41, %43, %37 : vector<8x16xi1>, vector<8x16xi32>
    %cst_15 = arith.constant dense<2147483647> : vector<8xi32>
    %45 = vector.multi_reduction <minsi>, %44, %cst_15 [1] : vector<8x16xi32> to vector<8xi32>
    %46 = vector.shape_cast %45 : vector<8xi32> to vector<8x1xi32>
    %47 = vector.broadcast %46 : vector<8x1xi32> to vector<8x16xi32>
    %48 = arith.cmpi eq, %44, %47 : vector<8x16xi32>
    %49 = arith.ori %42, %48 : vector<8x16xi1>
    %c2147483647_i32_16 = arith.constant 2147483647 : i32
    %50 = vector.broadcast %c2147483647_i32_16 : i32 to vector<8x16xi32>
    %51 = arith.select %48, %50, %44 : vector<8x16xi1>, vector<8x16xi32>
    %cst_17 = arith.constant dense<2147483647> : vector<8xi32>
    %52 = vector.multi_reduction <minsi>, %51, %cst_17 [1] : vector<8x16xi32> to vector<8xi32>
    %53 = vector.shape_cast %52 : vector<8xi32> to vector<8x1xi32>
    %54 = vector.broadcast %53 : vector<8x1xi32> to vector<8x16xi32>
    %55 = arith.cmpi eq, %51, %54 : vector<8x16xi32>
    %56 = arith.ori %49, %55 : vector<8x16xi1>
    %c2147483647_i32_18 = arith.constant 2147483647 : i32
    %57 = vector.broadcast %c2147483647_i32_18 : i32 to vector<8x16xi32>
    %58 = arith.select %55, %57, %51 : vector<8x16xi1>, vector<8x16xi32>
    %cst_19 = arith.constant dense<2147483647> : vector<8xi32>
    %59 = vector.multi_reduction <minsi>, %58, %cst_19 [1] : vector<8x16xi32> to vector<8xi32>
    %60 = vector.shape_cast %59 : vector<8xi32> to vector<8x1xi32>
    %61 = vector.broadcast %60 : vector<8x1xi32> to vector<8x16xi32>
    %62 = arith.cmpi eq, %58, %61 : vector<8x16xi32>
    %63 = arith.ori %56, %62 : vector<8x16xi1>
    %c2147483647_i32_20 = arith.constant 2147483647 : i32
    %64 = vector.broadcast %c2147483647_i32_20 : i32 to vector<8x16xi32>
    %65 = arith.select %62, %64, %58 : vector<8x16xi1>, vector<8x16xi32>
    %cst_21 = arith.constant dense<2147483647> : vector<8xi32>
    %66 = vector.multi_reduction <minsi>, %65, %cst_21 [1] : vector<8x16xi32> to vector<8xi32>
    %67 = vector.shape_cast %66 : vector<8xi32> to vector<8x1xi32>
    %68 = vector.broadcast %67 : vector<8x1xi32> to vector<8x16xi32>
    %69 = arith.cmpi eq, %65, %68 : vector<8x16xi32>
    %70 = arith.ori %63, %69 : vector<8x16xi1>
    %cst_22 = arith.constant 0.000000e+00 : f32
    %71 = vector.broadcast %cst_22 : f32 to vector<8x16xf32>
    %72 = arith.select %70, %17, %71 : vector<8x16xi1>, vector<8x16xf32>
    %cst_23 = arith.constant dense<0.000000e+00> : vector<8xf32>
    %73 = vector.multi_reduction <add>, %72, %cst_23 [1] : vector<8x16xf32> to vector<8xf32>
    %74 = vector.shape_cast %73 : vector<8xf32> to vector<8x1xf32>
    %75 = arith.subf %29, %74 : vector<8x1xf32>
    %76 = vector.shape_cast %75 : vector<8x1xf32> to vector<1x8x1xf32>
    %cst_24 = arith.constant dense<0.000000e+00> : vector<1xf32>
    %77 = vector.multi_reduction <add>, %76, %cst_24 [1, 2] : vector<1x8x1xf32> to vector<1xf32>
    %78 = vector.shape_cast %77 : vector<1xf32> to vector<1x1x1xf32>
    %79 = vector.extract %78[0, 0, 0] : f32 from vector<1x1x1xf32>
    %cst_25 = arith.constant 1.250000e-03 : f32
    %80 = arith.mulf %79, %cst_25 : f32
    %c0_26 = arith.constant 0 : index
    %c0_27 = arith.constant 0 : index
    %81 = memref.load %arg3[%c0_26, %c0_27] : memref<1x1xf32, #tpu.memory_space<smem>>
    memref.store %80, %arg3[%c0_26, %c0_27] : memref<1x1xf32, #tpu.memory_space<smem>>
    return
  }
}

</mosaic_0001>

<bundles_post_ra>
// kernel: weighted_point_loss.1
= control target key start
LH: loop header
LB: loop body
LE: loop exit
PB: predicated region body
PF: predicated region fallthrough
CT: control target
= control target key end

     0   :  { %vm28_vm0 = vcmask 1043456   ;;  %vm29_vm1 = vcmask 1044480   ;;  %v253_v3 = vmov 65535   ;;  %s327_s0 = inlined_call_operand.vmem [shape: bf16[8,9], index: 0, kind: input, shape index: {}]   ;;  %s328_s1 = inlined_call_operand.vmem [shape: bf16[8,9], index: 1, kind: input, shape index: {}]   ;;  %s329_s2 = inlined_call_operand.vmem [shape: bf16[9,16], index: 2, kind: input, shape index: {}]   ;;  %s330_s3 = inlined_call_operand.hbm [shape: f32[1,1], index: 3, kind: output, shape index: {}]  }
   0x1   :  { %v227_v0 = vld [vmem:[%s329_s2] sm:$0xf]  ;;  %v232_v1 = vld [vmem:[%s329_s2] sm:$0x10]  ;;  %v30_v4 = vsel %vm28_vm0, 4294967295, %v253_v3 }
   0x2   :  { %v228_v2 = vor.u32 %v232_v1, %v227_v0 }
   0x3   :  { %8 = vsyncpa [#allocation3], 0  ;;  %v31_v5 = vsel %vm29_vm1, %v30_v4, 0  ;;  %v18_v7 = vld [vmem:[%s327_s0] sm:$0xf]  ;;  %vm24_vm2 = vcmask 72704   ;;  %v73_v17 = vlaneseq }
   0x4   :  { %v33_v6 = vand.u32 %v228_v2, %v31_v5  ;;  %v48_v8 = vld [vmem:[%s328_s1] sm:$0xf]  ;;  %vm81_vm5 = vcmask 130048   ;;  %s215_s2 = sshll.u32 %s330_s3, 4  ;;  %s254_s22 = smov [#allocation2]   ;;  %s216_s2 = int_to_ptr.hbm [resolvable:$true] %s215_s2 }
   0x5   :  { %v74_v22 = vand.u32 127, %v73_v17 }
   0x6   :  { %42 = vmatpush.bf16.msra.mxu0 %v33_v6  ;;  %59 = vmatpush.bf16.msra.mxu1 %v33_v6 }
   0x9   :  { %229 = vmatmul.msk.bf16.vlgmr.msra.gmra.mxu0 %vm24_vm2, %v18_v7  ;;  %230 = vmatmul.msk.bf16.vlgmr.msra.gmra.mxu1 %vm24_vm2, %v48_v8 }
  0x86   :  { %v44_v9 = vpop.f32.mrf.mxu0  ;;  %v61_v10 = vpop.f32.mrf.mxu1 }
  0x87   :  { %v65_v11 = vand.u32 2147483647, %v44_v9  ;;  %v67_v12 = vmul.f32 0.5, %v44_v9  ;;  %237 = vrcp.f32 %v61_v10 }
  0x89   :  { %v68_v13 = vmul.f32 %v67_v12, %v44_v9  ;;  %v231_v14 = vadd.f32 -0.5, %v65_v11  ;;  %vm66_vm3 = vcmp.lt.f32.partialorder %v65_v11, 1.0 }
  0x8b   :  { %v70_v16 = vsel %vm66_vm3, %v68_v13, %v231_v14 }
  0x8d   :  { %v238_v15 = vpop.eup %237 }
  0x8e   :  { %v287_v18 = vmul.f32 %v238_v15, %v70_v16  ;;  %v46_v19 = vpop.f32.mrf.mxu0  ;;  %v63_v20 = vpop.f32.mrf.mxu1 }
  0x90   :  { %vm76_vm4 = vcmp.lt.s32.totalorder %v287_v18, 0  ;;  %v77_v21 = vxor.u32 2147483647, %v287_v18 }
  0x92   :  { %v78_v23 = vsel %vm76_vm4, %v77_v21, %v287_v18 }
  0x93   :  { %v79_v24 = vand.u32 4294967280, %v78_v23 }
  0x95   :  { %v80_v25 = vor.u32 %v79_v24, %v74_v22  ;;  %v82_v24 = vsel %vm81_vm5, %v287_v18, 0.0 }
  0x97   :  { %v85_v26 = vsel %vm81_vm5, %v80_v25, 2147483647 }
  0x98   :  { %v87_v27 = vshra.s32 %v85_v26, 16  ;;  %v86_v29 = vand.u32 65535, %v85_v26 }
  0x9a   :  { %v89_v28 = vcvt.s32.f32 %v87_v27  ;;  %v88_v31 = vcvt.s32.f32 %v86_v29 }
  0x9c   :  { %90 = vmin.xlane.f32.xlu0 %v89_v28 }
 0x10f   :  { %v91_v30 = vpop.xlane.xlu0 %90 }
 0x110   :  { %vm92_vm6 = vcmp.eq.f32.partialorder %v89_v28, %v91_v30  ;;  %v97_v33 = vcvt.f32.s32 %v91_v30 }
 0x111   :  { %v93_v32 = vsel %vm92_vm6, %v88_v31, inf }
 0x112   :  { %94 = vmin.xlane.f32.xlu0 %v93_v32  ;;  %v98_v35 = vshll.u32 %v97_v33, 16 }
 0x185   :  { %v95_v34 = vpop.xlane.xlu0 %94 }
 0x186   :  { %v96_v36 = vcvt.f32.s32 %v95_v34 }
 0x188   :  { %v99_v37 = vadd.s32 %v98_v35, %v96_v36 }
 0x18a   :  { %vm100_vm7 = vcmp.eq.s32.totalorder %v80_v25, %v99_v37 }
 0x18b   :  { %v101_v38 = vsel %vm100_vm7, 2147483647, %v80_v25 }
 0x18c   :  { %v102_v39 = vsel %vm81_vm5, %v101_v38, 2147483647 }
 0x18d   :  { %v104_v40 = vshra.s32 %v102_v39, 16  ;;  %v103_v42 = vand.u32 65535, %v102_v39 }
 0x18f   :  { %v106_v41 = vcvt.s32.f32 %v104_v40  ;;  %v105_v44 = vcvt.s32.f32 %v103_v42 }
 0x191   :  { %107 = vmin.xlane.f32.xlu1 %v106_v41 }
 0x204   :  { %v108_v43 = vpop.xlane.xlu1 %107 }
 0x205   :  { %vm109_vm8 = vcmp.eq.f32.partialorder %v106_v41, %v108_v43  ;;  %v114_v46 = vcvt.f32.s32 %v108_v43 }
 0x206   :  { %v110_v45 = vsel %vm109_vm8, %v105_v44, inf  ;;  %vm196_vm8 = vcmask 7168  }
 0x207   :  { %111 = vmin.xlane.f32.xlu1 %v110_v45  ;;  %v115_v48 = vshll.u32 %v114_v46, 16 }
 0x27a   :  { %v112_v47 = vpop.xlane.xlu1 %111 }
 0x27b   :  { %v113_v49 = vcvt.f32.s32 %v112_v47 }
 0x27d   :  { %v116_v50 = vadd.s32 %v115_v48, %v113_v49 }
 0x27f   :  { %vm117_vm9 = vcmp.eq.s32.totalorder %v101_v38, %v116_v50 }
 0x280   :  { %v119_v51 = vsel %vm117_vm9, 2147483647, %v101_v38  ;;  %vm118_vm11 = vmor %vm100_vm7, %vm117_vm9 }
 0x281   :  { %v120_v52 = vsel %vm81_vm5, %v119_v51, 2147483647 }
 0x282   :  { %v122_v53 = vshra.s32 %v120_v52, 16  ;;  %v121_v55 = vand.u32 65535, %v120_v52 }
 0x284   :  { %v124_v54 = vcvt.s32.f32 %v122_v53  ;;  %v123_v57 = vcvt.s32.f32 %v121_v55 }
 0x286   :  { %125 = vmin.xlane.f32.xlu2 %v124_v54 }
 0x2f9   :  { %v126_v56 = vpop.xlane.xlu2 %125 }
 0x2fa   :  { %vm127_vm10 = vcmp.eq.f32.partialorder %v124_v54, %v126_v56  ;;  %v132_v59 = vcvt.f32.s32 %v126_v56 }
 0x2fb   :  { %v128_v58 = vsel %vm127_vm10, %v123_v57, inf }
 0x2fc   :  { %129 = vmin.xlane.f32.xlu2 %v128_v58  ;;  %v133_v61 = vshll.u32 %v132_v59, 16 }
 0x36f   :  { %v130_v60 = vpop.xlane.xlu2 %129 }
 0x370   :  { %v131_v62 = vcvt.f32.s32 %v130_v60 }
 0x372   :  { %v134_v63 = vadd.s32 %v133_v61, %v131_v62 }
 0x374   :  { %vm135_vm12 = vcmp.eq.s32.totalorder %v119_v51, %v134_v63 }
 0x375   :  { %v137_v0 = vsel %vm135_vm12, 2147483647, %v119_v51  ;;  %vm299_vm13 = vmor %vm118_vm11, %vm135_vm12 }
 0x376   :  { %v138_v2 = vsel %vm81_vm5, %v137_v0, 2147483647 }
 0x377   :  { %v140_v3 = vshra.s32 %v138_v2, 16  ;;  %v139_v5 = vand.u32 65535, %v138_v2 }
 0x379   :  { %v142_v4 = vcvt.s32.f32 %v140_v3  ;;  %v141_v7 = vcvt.s32.f32 %v139_v5 }
 0x37b   :  { %143 = vmin.xlane.f32.xlu0 %v142_v4 }
 0x3ee   :  { %v144_v6 = vpop.xlane.xlu0 %143 }
 0x3ef   :  { %vm145_vm14 = vcmp.eq.f32.partialorder %v142_v4, %v144_v6  ;;  %v150_v9 = vcvt.f32.s32 %v144_v6 }
 0x3f0   :  { %v146_v8 = vsel %vm145_vm14, %v141_v7, inf }
 0x3f1   :  { %147 = vmin.xlane.f32.xlu1 %v146_v8  ;;  %v151_v11 = vshll.u32 %v150_v9, 16 }
 0x464   :  { %v148_v10 = vpop.xlane.xlu1 %147 }
 0x465   :  { %v149_v12 = vcvt.f32.s32 %v148_v10 }
 0x467   :  { %v152_v13 = vadd.s32 %v151_v11, %v149_v12 }
 0x469   :  { %vm153_vm15 = vcmp.eq.s32.totalorder %v137_v0, %v152_v13 }
 0x46a   :  { %v155_v14 = vsel %vm153_vm15, 2147483647, %v137_v0  ;;  %vm306_vm0 = vmor %vm299_vm13, %vm153_vm15 }
 0x46b   :  { %v156_v16 = vsel %vm81_vm5, %v155_v14, 2147483647 }
 0x46c   :  { %v158_v17 = vshra.s32 %v156_v16, 16  ;;  %v157_v20 = vand.u32 65535, %v156_v16 }
 0x46e   :  { %v160_v19 = vcvt.s32.f32 %v158_v17  ;;  %v159_v22 = vcvt.s32.f32 %v157_v20 }
 0x470   :  { %161 = vmin.xlane.f32.xlu2 %v160_v19 }
 0x4e3   :  { %v162_v21 = vpop.xlane.xlu2 %161 }
 0x4e4   :  { %vm163_vm1 = vcmp.eq.f32.partialorder %v160_v19, %v162_v21  ;;  %v168_v25 = vcvt.f32.s32 %v162_v21 }
 0x4e5   :  { %v164_v23 = vsel %vm163_vm1, %v159_v22, inf }
 0x4e6   :  { %165 = vmin.xlane.f32.xlu0 %v164_v23  ;;  %v169_v27 = vshll.u32 %v168_v25, 16 }
 0x4ee   :  { %83 = vadd.xlane.f32.xlu0 %v82_v24 }
 0x559   :  { %v166_v26 = vpop.xlane.xlu0 %165 }
 0x55a   :  { %v167_v28 = vcvt.f32.s32 %v166_v26 }
 0x55c   :  { %v170_v29 = vadd.s32 %v169_v27, %v167_v28 }
 0x55e   :  { %vm171_vm2 = vcmp.eq.s32.totalorder %v155_v14, %v170_v29 }
 0x55f   :  { %v173_v30 = vsel %vm171_vm2, 2147483647, %v155_v14  ;;  %vm315_vm3 = vmor %vm306_vm0, %vm171_vm2 }
 0x560   :  { %v174_v32 = vsel %vm81_vm5, %v173_v30, 2147483647 }
 0x561   :  { %v176_v33 = vshra.s32 %v174_v32, 16  ;;  %v175_v35 = vand.u32 65535, %v174_v32  ;;  %v84_v46 = vpop.xlane.xlu0 %83 }
 0x563   :  { %v178_v34 = vcvt.s32.f32 %v176_v33  ;;  %v177_v37 = vcvt.s32.f32 %v175_v35 }
 0x565   :  { %179 = vmin.xlane.f32.xlu1 %v178_v34 }
 0x5d8   :  { %v180_v36 = vpop.xlane.xlu1 %179 }
 0x5d9   :  { %vm181_vm4 = vcmp.eq.f32.partialorder %v178_v34, %v180_v36  ;;  %v186_v39 = vcvt.f32.s32 %v180_v36 }
 0x5da   :  { %v182_v38 = vsel %vm181_vm4, %v177_v37, inf }
 0x5db   :  { %183 = vmin.xlane.f32.xlu2 %v182_v38  ;;  %v187_v41 = vshll.u32 %v186_v39, 16 }
 0x64e   :  { %v184_v40 = vpop.xlane.xlu2 %183 }
 0x64f   :  { %v185_v42 = vcvt.f32.s32 %v184_v40 }
 0x651   :  { %v188_v43 = vadd.s32 %v187_v41, %v185_v42 }
 0x653   :  { %vm189_vm6 = vcmp.eq.s32.totalorder %v173_v30, %v188_v43 }
 0x654   :  { %vm190_vm7 = vmor %vm315_vm3, %vm189_vm6 }
 0x655   :  { %v191_v44 = vsel %vm190_vm7, %v287_v18, 0.0 }
 0x656   :  { %v192_v45 = vsel %vm81_vm5, %v191_v44, 0.0 }
 0x657   :  { %193 = vadd.xlane.f32.xlu1 %v192_v45 }
 0x6ca   :  { %v194_v47 = vpop.xlane.xlu1 %193 }
 0x6cb   :  { %v195_v48 = vsub.f32 %v84_v46, %v194_v47 }
 0x6cd   :  { %v197_v49 = vsel %vm196_vm8, %v195_v48, 0.0 }
 0x6ce   :  { %198 = vadd.xlane.f32.xlu2 %v197_v49 }
 0x741   :  { %v199_v50 = vpop.xlane.xlu2 %198 }
 0x742   :  { %v200_v51 = vrot.slane %v199_v50, 4 }
 0x744   :  { %v201_v52 = vadd.f32 %v200_v51, %v199_v50 }
 0x746   :  { %v202_v53 = vrot.slane %v201_v52, 2 }
 0x748   :  { %v203_v54 = vadd.f32 %v202_v53, %v201_v52 }
 0x74a   :  { %v204_v55 = vrot.slane %v203_v54, 1 }
 0x74c   :  { %v205_v56 = vadd.f32 %v204_v55, %v203_v54 }
 0x74e   :  { %233 = vpush %v205_v56 }
 0x77f   :  { %s234_s20 = spop %233 }
 0x780   :  { %s207_s21 = smul.f32 0.00125, %s234_s20 }
 0x782   :  { %209 = sst [smem:[#allocation2]] %s207_s21 }
 0x783   :  { %218 = dma.smem_to_hbm %s254_s22, 16, %s216_s2, [#allocation3]  }
 0x784   :  { %251 = dma.done.wait [#allocation3], 16  }
 0x785   :  { %252 = vsyncadd [#allocation3], 4294967280 }
 0x786   :  { %223 = sfence }
 0x787   :  { %224 = vsyncpa [#allocation3], 1 }

</bundles_post_ra>
